<compile_context>
chip_gen: v7x
topology: tpu7x:2x2x1
jax: 0.10.0
libtpu: 0.0.40
codegen_flags: <defaults>
</compile_context>

<pallas_src>
import jax
import jax.numpy as jnp
from jax.experimental import pallas as pl
from jax.experimental.pallas import tpu as pltpu


def _round_up(x, m):
    return ((x + m - 1) // m) * m


def _vmem_capacity_bytes():
    # v5e/v6e: 128 MiB, v7x: 64 MiB.  Fall back to the smallest (v7x) figure if
    # the query is unavailable so the tiling stays safe on every generation.
    try:
        cap = getattr(pltpu.get_tpu_info(), "vmem_capacity_bytes", None)
        if cap:
            return int(cap)
    except Exception:
        pass
    return 64 * 1024 * 1024


def _outconv_kernel(x_ref, w_ref, b_ref, o_ref):
    # x_ref: (NB, Cin, TS) VMEM   w_ref: (Cout, Cin) SMEM f32
    # b_ref: (Cout,) SMEM f32     o_ref: (NB, Cout, TS) VMEM
    cin = x_ref.shape[1]
    cout = o_ref.shape[1]
    # Degenerate-channel 1x1 conv: Cout*Cin broadcast-FMAs on the VPU, scalars
    # broadcast straight from SMEM, f32 accumulation.
    for co in range(cout):
        acc = x_ref[:, 0, :].astype(jnp.float32) * w_ref[co, 0]
        for ci in range(1, cin):
            acc = acc + x_ref[:, ci, :].astype(jnp.float32) * w_ref[co, ci]
        o_ref[:, co, :] = (acc + b_ref[co]).astype(o_ref.dtype)


def outconv_forward(x_nchw, weight, bias, *, tile_lane_cap=None):
    """1x1 conv forward (NCHW in, NCHW out).

    x_nchw : (N, Cin, H, W)
    weight : (Cout, Cin, 1, 1)   -- PyTorch Conv2d weight shape
    bias   : (Cout,)
    tile_lane_cap : optional cap (in lanes) on the spatial tile, for testing
                    the multi-tile / clipped-boundary path at small shapes.
    """
    n, cin, h, w = x_nchw.shape
    cout = weight.shape[0]
    hw = h * w
    itemsize = jnp.dtype(x_nchw.dtype).itemsize

    x_flat = x_nchw.reshape(n, cin, hw)                       # free reshape
    w_mat = weight.reshape(cout, cin).astype(jnp.float32)     # scalars, SMEM
    b_vec = bias.reshape(cout).astype(jnp.float32)            # scalars, SMEM

    # ---- spatial tile derived from the per-generation VMEM budget ----------
    vmem_cap = _vmem_capacity_bytes()
    # Budget for the double-buffered x/out blocks; the rest is headroom for
    # intermediates and compiler scratch.
    tile_budget = min(int(vmem_cap * 0.45), 96 * 1024 * 1024)
    # Bytes per lane of one (x + out) block pair, counting sublane padding to 8
    # rows of 32-bit words (conservative for sub-32-bit dtypes too).
    bytes_per_lane = (_round_up(cin, 8) + _round_up(cout, 8)) * 4
    budget_lanes = tile_budget // (2 * bytes_per_lane)        # 2 = double buffer
    ts_budget = max(128, (budget_lanes // 128) * 128)
    ts_budget = min(ts_budget, 256 * 1024)                    # diminishing returns
    if tile_lane_cap is not None:
        ts_budget = max(128, min(ts_budget, _round_up(int(tile_lane_cap), 128)))

    hw_al = _round_up(hw, 128)
    if hw_al <= ts_budget:
        # Whole image fits in one spatial tile: block equals the full H*W dim
        # (always layout-legal, ragged or not) and we fold images per block.
        ts_eff = hw
        nb_max = max(1, min(n, ts_budget // hw_al))
        nb = pl.cdiv(n, pl.cdiv(n, nb_max))                   # balanced batch blocks
    else:
        # Large image: several big tiles per image.  Keep >= ~8 spatial steps
        # when each tile can still be >= 64K lanes (v7x 2-TC split + pipeline).
        nb = 1
        natural = pl.cdiv(hw, ts_budget)
        target = min(8, max(natural, hw // (64 * 1024)))
        steps = max(natural, target)
        ts_eff = _round_up(pl.cdiv(hw, steps), 128)

    grid = (pl.cdiv(n, nb), pl.cdiv(hw, ts_eff))              # both parallel

    vmem_limit = min(int(vmem_cap * 0.8), vmem_cap - 2 * 1024 * 1024)
    vmem_limit = max(vmem_limit, 16 * 1024 * 1024)

    cost = pl.CostEstimate(
        flops=2 * n * cout * cin * hw,
        transcendentals=0,
        bytes_accessed=(n * cin * hw + n * cout * hw) * itemsize
        + (cout * cin + cout) * 4,
    )

    out_flat = pl.pallas_call(
        _outconv_kernel,
        out_shape=jax.ShapeDtypeStruct((n, cout, hw), x_nchw.dtype),
        grid_spec=pltpu.PrefetchScalarGridSpec(
            num_scalar_prefetch=0,
            grid=grid,
            in_specs=[
                # x: (NB, Cin, TS) block; boundary blocks clipped by Pallas.
                pl.BlockSpec((nb, cin, ts_eff), lambda b, s: (b, 0, s)),
                # weight / bias: whole tiny arrays resident in SMEM.
                pl.BlockSpec(memory_space=pltpu.MemorySpace.SMEM),
                pl.BlockSpec(memory_space=pltpu.MemorySpace.SMEM),
            ],
            out_specs=pl.BlockSpec((nb, cout, ts_eff), lambda b, s: (b, 0, s)),
        ),
        compiler_params=pltpu.CompilerParams(
            dimension_semantics=("parallel", "parallel"),
            vmem_limit_bytes=int(vmem_limit),
        ),
        cost_estimate=cost,
    )(x_flat, w_mat, b_vec)

    return out_flat.reshape(n, cout, h, w)


def _reference(x, weight, bias):
    cout, cin = weight.shape[0], weight.shape[1]
    return jnp.einsum(
        "nchw,oc->nohw", x, weight.reshape(cout, cin), precision="highest"
    ) + bias.reshape(1, cout, 1, 1)


if __name__ == "__main__":
    key = jax.random.PRNGKey(0)
    kx, kw, kb = jax.random.split(key, 3)

    batch, in_ch, out_ch, hw = 2, 4, 3, 16
    x = jax.random.normal(kx, (batch, in_ch, hw, hw), dtype=jnp.float32)

    # Deterministic Conv2d-style init (uniform in +-1/sqrt(fan_in)).
    bound = 1.0 / jnp.sqrt(float(in_ch))
    weight = jax.random.uniform(kw, (out_ch, in_ch, 1, 1),
                                minval=-bound, maxval=bound, dtype=jnp.float32)
    bias = jax.random.uniform(kb, (out_ch,),
                              minval=-bound, maxval=bound, dtype=jnp.float32)

    # 1) Small aligned image (single fused block, batch folded).
    out = outconv_forward(x, weight, bias)
    jax.block_until_ready(out)
    ref = _reference(x, weight, bias)
    assert out.shape == (batch, out_ch, hw, hw)
    assert jnp.allclose(out, ref, atol=1e-4, rtol=1e-4)

    # 2) Ragged spatial extent (block equals the full, non-128-aligned H*W).
    x2 = jax.random.normal(kx, (batch, in_ch, 5, 7), dtype=jnp.float32)
    out2 = outconv_forward(x2, weight, bias)
    jax.block_until_ready(out2)
    assert jnp.allclose(out2, _reference(x2, weight, bias), atol=1e-4, rtol=1e-4)

    # 3) Multi-tile spatial grid with a clipped boundary block (forced small tile).
    x3 = jax.random.normal(kx, (batch, in_ch, 40, 40), dtype=jnp.float32)
    out3 = outconv_forward(x3, weight, bias, tile_lane_cap=512)
    jax.block_until_ready(out3)
    assert jnp.allclose(out3, _reference(x3, weight, bias), atol=1e-4, rtol=1e-4)

    print("KERNEL_OK")
</pallas_src>

<mosaic_0001>
module attributes {stable_mosaic.version = 11 : i64} {
  func.func @_outconv_kernel(%arg0: i32, %arg1: i32, %arg2: memref<2x4x256xf32, #tpu.memory_space<vmem>>, %arg3: memref<3x4xf32, #tpu.memory_space<smem>>, %arg4: memref<3xf32, #tpu.memory_space<smem>>, %arg5: memref<2x3x256xf32, #tpu.memory_space<vmem>>) attributes {dimension_semantics = [#tpu.dimension_semantics<parallel>, #tpu.dimension_semantics<parallel>], iteration_bounds = array<i64: 1, 1>, scalar_prefetch = 0 : i64, scratch_operands = 0 : i64, tpu.core_type = #tpu.core_type<tc>, window_params = [{transform_indices = @transform_0, window_bounds = array<i64: 2, 4, 256>}, {transform_indices = @transform_1, window_bounds = array<i64: 3, 4>}, {transform_indices = @transform_2, window_bounds = array<i64: 3>}, {transform_indices = @transform_3, window_bounds = array<i64: 2, 3, 256>}]} {
    %c0 = arith.constant 0 : index
    %c0_0 = arith.constant 0 : index
    %c0_1 = arith.constant 0 : index
    %0 = vector.load %arg2[%c0, %c0_0, %c0_1] : memref<2x4x256xf32, #tpu.memory_space<vmem>>, vector<2x1x256xf32>
    %1 = vector.shape_cast %0 : vector<2x1x256xf32> to vector<2x256xf32>
    %c0_2 = arith.constant 0 : index
    %c0_3 = arith.constant 0 : index
    %2 = memref.load %arg3[%c0_2, %c0_3] : memref<3x4xf32, #tpu.memory_space<smem>>
    %3 = vector.broadcast %2 : f32 to vector<2x256xf32>
    %4 = arith.mulf %1, %3 : vector<2x256xf32>
    %c0_4 = arith.constant 0 : index
    %c1 = arith.constant 1 : index
    %c0_5 = arith.constant 0 : index
    %5 = vector.load %arg2[%c0_4, %c1, %c0_5] : memref<2x4x256xf32, #tpu.memory_space<vmem>>, vector<2x1x256xf32>
    %6 = vector.shape_cast %5 : vector<2x1x256xf32> to vector<2x256xf32>
    %c0_6 = arith.constant 0 : index
    %c1_7 = arith.constant 1 : index
    %7 = memref.load %arg3[%c0_6, %c1_7] : memref<3x4xf32, #tpu.memory_space<smem>>
    %8 = vector.broadcast %7 : f32 to vector<2x256xf32>
    %9 = arith.mulf %6, %8 : vector<2x256xf32>
    %10 = arith.addf %4, %9 : vector<2x256xf32>
    %c0_8 = arith.constant 0 : index
    %c2 = arith.constant 2 : index
    %c0_9 = arith.constant 0 : index
    %11 = vector.load %arg2[%c0_8, %c2, %c0_9] : memref<2x4x256xf32, #tpu.memory_space<vmem>>, vector<2x1x256xf32>
    %12 = vector.shape_cast %11 : vector<2x1x256xf32> to vector<2x256xf32>
    %c0_10 = arith.constant 0 : index
    %c2_11 = arith.constant 2 : index
    %13 = memref.load %arg3[%c0_10, %c2_11] : memref<3x4xf32, #tpu.memory_space<smem>>
    %14 = vector.broadcast %13 : f32 to vector<2x256xf32>
    %15 = arith.mulf %12, %14 : vector<2x256xf32>
    %16 = arith.addf %10, %15 : vector<2x256xf32>
    %c0_12 = arith.constant 0 : index
    %c3 = arith.constant 3 : index
    %c0_13 = arith.constant 0 : index
    %17 = vector.load %arg2[%c0_12, %c3, %c0_13] : memref<2x4x256xf32, #tpu.memory_space<vmem>>, vector<2x1x256xf32>
    %18 = vector.shape_cast %17 : vector<2x1x256xf32> to vector<2x256xf32>
    %c0_14 = arith.constant 0 : index
    %c3_15 = arith.constant 3 : index
    %19 = memref.load %arg3[%c0_14, %c3_15] : memref<3x4xf32, #tpu.memory_space<smem>>
    %20 = vector.broadcast %19 : f32 to vector<2x256xf32>
    %21 = arith.mulf %18, %20 : vector<2x256xf32>
    %22 = arith.addf %16, %21 : vector<2x256xf32>
    %c0_16 = arith.constant 0 : index
    %23 = memref.load %arg4[%c0_16] : memref<3xf32, #tpu.memory_space<smem>>
    %24 = vector.broadcast %23 : f32 to vector<2x256xf32>
    %25 = arith.addf %22, %24 : vector<2x256xf32>
    %c0_17 = arith.constant 0 : index
    %c0_18 = arith.constant 0 : index
    %c0_19 = arith.constant 0 : index
    %26 = vector.load %arg5[%c0_17, %c0_18, %c0_19] : memref<2x3x256xf32, #tpu.memory_space<vmem>>, vector<2x1x256xf32>
    %27 = vector.shape_cast %26 : vector<2x1x256xf32> to vector<2x256xf32>
    %28 = vector.shape_cast %25 : vector<2x256xf32> to vector<2x1x256xf32>
    tpu.vector_store %arg5[%c0_17, %c0_18, %c0_19], %28 {strides = array<i32>} : memref<2x3x256xf32, #tpu.memory_space<vmem>>, vector<2x1x256xf32>,
    %c0_20 = arith.constant 0 : index
    %c0_21 = arith.constant 0 : index
    %c0_22 = arith.constant 0 : index
    %29 = vector.load %arg2[%c0_20, %c0_21, %c0_22] : memref<2x4x256xf32, #tpu.memory_space<vmem>>, vector<2x1x256xf32>
    %30 = vector.shape_cast %29 : vector<2x1x256xf32> to vector<2x256xf32>
    %c1_23 = arith.constant 1 : index
    %c0_24 = arith.constant 0 : index
    %31 = memref.load %arg3[%c1_23, %c0_24] : memref<3x4xf32, #tpu.memory_space<smem>>
    %32 = vector.broadcast %31 : f32 to vector<2x256xf32>
    %33 = arith.mulf %30, %32 : vector<2x256xf32>
    %c0_25 = arith.constant 0 : index
    %c1_26 = arith.constant 1 : index
    %c0_27 = arith.constant 0 : index
    %34 = vector.load %arg2[%c0_25, %c1_26, %c0_27] : memref<2x4x256xf32, #tpu.memory_space<vmem>>, vector<2x1x256xf32>
    %35 = vector.shape_cast %34 : vector<2x1x256xf32> to vector<2x256xf32>
    %c1_28 = arith.constant 1 : index
    %c1_29 = arith.constant 1 : index
    %36 = memref.load %arg3[%c1_28, %c1_29] : memref<3x4xf32, #tpu.memory_space<smem>>
    %37 = vector.broadcast %36 : f32 to vector<2x256xf32>
    %38 = arith.mulf %35, %37 : vector<2x256xf32>
    %39 = arith.addf %33, %38 : vector<2x256xf32>
    %c0_30 = arith.constant 0 : index
    %c2_31 = arith.constant 2 : index
    %c0_32 = arith.constant 0 : index
    %40 = vector.load %arg2[%c0_30, %c2_31, %c0_32] : memref<2x4x256xf32, #tpu.memory_space<vmem>>, vector<2x1x256xf32>
    %41 = vector.shape_cast %40 : vector<2x1x256xf32> to vector<2x256xf32>
    %c1_33 = arith.constant 1 : index
    %c2_34 = arith.constant 2 : index
    %42 = memref.load %arg3[%c1_33, %c2_34] : memref<3x4xf32, #tpu.memory_space<smem>>
    %43 = vector.broadcast %42 : f32 to vector<2x256xf32>
    %44 = arith.mulf %41, %43 : vector<2x256xf32>
    %45 = arith.addf %39, %44 : vector<2x256xf32>
    %c0_35 = arith.constant 0 : index
    %c3_36 = arith.constant 3 : index
    %c0_37 = arith.constant 0 : index
    %46 = vector.load %arg2[%c0_35, %c3_36, %c0_37] : memref<2x4x256xf32, #tpu.memory_space<vmem>>, vector<2x1x256xf32>
    %47 = vector.shape_cast %46 : vector<2x1x256xf32> to vector<2x256xf32>
    %c1_38 = arith.constant 1 : index
    %c3_39 = arith.constant 3 : index
    %48 = memref.load %arg3[%c1_38, %c3_39] : memref<3x4xf32, #tpu.memory_space<smem>>
    %49 = vector.broadcast %48 : f32 to vector<2x256xf32>
    %50 = arith.mulf %47, %49 : vector<2x256xf32>
    %51 = arith.addf %45, %50 : vector<2x256xf32>
    %c1_40 = arith.constant 1 : index
    %52 = memref.load %arg4[%c1_40] : memref<3xf32, #tpu.memory_space<smem>>
    %53 = vector.broadcast %52 : f32 to vector<2x256xf32>
    %54 = arith.addf %51, %53 : vector<2x256xf32>
    %c0_41 = arith.constant 0 : index
    %c1_42 = arith.constant 1 : index
    %c0_43 = arith.constant 0 : index
    %55 = vector.load %arg5[%c0_41, %c1_42, %c0_43] : memref<2x3x256xf32, #tpu.memory_space<vmem>>, vector<2x1x256xf32>
    %56 = vector.shape_cast %55 : vector<2x1x256xf32> to vector<2x256xf32>
    %57 = vector.shape_cast %54 : vector<2x256xf32> to vector<2x1x256xf32>
    tpu.vector_store %arg5[%c0_41, %c1_42, %c0_43], %57 {strides = array<i32>} : memref<2x3x256xf32, #tpu.memory_space<vmem>>, vector<2x1x256xf32>,
    %c0_44 = arith.constant 0 : index
    %c0_45 = arith.constant 0 : index
    %c0_46 = arith.constant 0 : index
    %58 = vector.load %arg2[%c0_44, %c0_45, %c0_46] : memref<2x4x256xf32, #tpu.memory_space<vmem>>, vector<2x1x256xf32>
    %59 = vector.shape_cast %58 : vector<2x1x256xf32> to vector<2x256xf32>
    %c2_47 = arith.constant 2 : index
    %c0_48 = arith.constant 0 : index
    %60 = memref.load %arg3[%c2_47, %c0_48] : memref<3x4xf32, #tpu.memory_space<smem>>
    %61 = vector.broadcast %60 : f32 to vector<2x256xf32>
    %62 = arith.mulf %59, %61 : vector<2x256xf32>
    %c0_49 = arith.constant 0 : index
    %c1_50 = arith.constant 1 : index
    %c0_51 = arith.constant 0 : index
    %63 = vector.load %arg2[%c0_49, %c1_50, %c0_51] : memref<2x4x256xf32, #tpu.memory_space<vmem>>, vector<2x1x256xf32>
    %64 = vector.shape_cast %63 : vector<2x1x256xf32> to vector<2x256xf32>
    %c2_52 = arith.constant 2 : index
    %c1_53 = arith.constant 1 : index
    %65 = memref.load %arg3[%c2_52, %c1_53] : memref<3x4xf32, #tpu.memory_space<smem>>
    %66 = vector.broadcast %65 : f32 to vector<2x256xf32>
    %67 = arith.mulf %64, %66 : vector<2x256xf32>
    %68 = arith.addf %62, %67 : vector<2x256xf32>
    %c0_54 = arith.constant 0 : index
    %c2_55 = arith.constant 2 : index
    %c0_56 = arith.constant 0 : index
    %69 = vector.load %arg2[%c0_54, %c2_55, %c0_56] : memref<2x4x256xf32, #tpu.memory_space<vmem>>, vector<2x1x256xf32>
    %70 = vector.shape_cast %69 : vector<2x1x256xf32> to vector<2x256xf32>
    %c2_57 = arith.constant 2 : index
    %c2_58 = arith.constant 2 : index
    %71 = memref.load %arg3[%c2_57, %c2_58] : memref<3x4xf32, #tpu.memory_space<smem>>
    %72 = vector.broadcast %71 : f32 to vector<2x256xf32>
    %73 = arith.mulf %70, %72 : vector<2x256xf32>
    %74 = arith.addf %68, %73 : vector<2x256xf32>
    %c0_59 = arith.constant 0 : index
    %c3_60 = arith.constant 3 : index
    %c0_61 = arith.constant 0 : index
    %75 = vector.load %arg2[%c0_59, %c3_60, %c0_61] : memref<2x4x256xf32, #tpu.memory_space<vmem>>, vector<2x1x256xf32>
    %76 = vector.shape_cast %75 : vector<2x1x256xf32> to vector<2x256xf32>
    %c2_62 = arith.constant 2 : index
    %c3_63 = arith.constant 3 : index
    %77 = memref.load %arg3[%c2_62, %c3_63] : memref<3x4xf32, #tpu.memory_space<smem>>
    %78 = vector.broadcast %77 : f32 to vector<2x256xf32>
    %79 = arith.mulf %76, %78 : vector<2x256xf32>
    %80 = arith.addf %74, %79 : vector<2x256xf32>
    %c2_64 = arith.constant 2 : index
    %81 = memref.load %arg4[%c2_64] : memref<3xf32, #tpu.memory_space<smem>>
    %82 = vector.broadcast %81 : f32 to vector<2x256xf32>
    %83 = arith.addf %80, %82 : vector<2x256xf32>
    %c0_65 = arith.constant 0 : index
    %c2_66 = arith.constant 2 : index
    %c0_67 = arith.constant 0 : index
    %84 = vector.load %arg5[%c0_65, %c2_66, %c0_67] : memref<2x3x256xf32, #tpu.memory_space<vmem>>, vector<2x1x256xf32>
    %85 = vector.shape_cast %84 : vector<2x1x256xf32> to vector<2x256xf32>
    %86 = vector.shape_cast %83 : vector<2x256xf32> to vector<2x1x256xf32>
    tpu.vector_store %arg5[%c0_65, %c2_66, %c0_67], %86 {strides = array<i32>} : memref<2x3x256xf32, #tpu.memory_space<vmem>>, vector<2x1x256xf32>,
    return
  }
  func.func @transform_0(%arg0: i32, %arg1: i32) -> (i32, i32, i32) {
    %c0_i32 = arith.constant 0 : i32
    %c0_i32_0 = arith.constant 0 : i32
    return %arg0, %c0_i32, %arg1 : i32, i32, i32
  }
  func.func @transform_1(%arg0: i32, %arg1: i32) -> (i32, i32) {
    %c0_i32 = arith.constant 0 : i32
    %c0_i32_0 = arith.constant 0 : i32
    %c0_i32_1 = arith.constant 0 : i32
    return %c0_i32, %c0_i32_0 : i32, i32
  }
  func.func @transform_2(%arg0: i32, %arg1: i32) -> i32 {
    %c0_i32 = arith.constant 0 : i32
    %c0_i32_0 = arith.constant 0 : i32
    return %c0_i32 : i32
  }
  func.func @transform_3(%arg0: i32, %arg1: i32) -> (i32, i32, i32) {
    %c0_i32 = arith.constant 0 : i32
    %c0_i32_0 = arith.constant 0 : i32
    return %arg0, %c0_i32, %arg1 : i32, i32, i32
  }
}

</mosaic_0001>

<bundles_post_ra>
// kernel: tpu_custom_call.1
= control target key start
LH: loop header
LB: loop body
LE: loop exit
PB: predicated region body
PF: predicated region fallthrough
CT: control target
= control target key end

     0   :  { %8 = vsyncpa [#allocation3], 0  ;;  %s374_s0 = inlined_call_operand.hbm [shape: f32[2,4,256], index: 0, kind: input, shape index: {}]   ;;  %s375_s1 = inlined_call_operand.hbm [shape: f32[3,4], index: 1, kind: input, shape index: {}]   ;;  %s376_s2 = inlined_call_operand.vmem [shape: f32[3], index: 2, kind: input, shape index: {}]   ;;  %s377_s3 = inlined_call_operand.vmem [shape: f32[2,3,256], index: 3, kind: output, shape index: {}]  }
   0x1   :  { %9 = vsyncpa [#allocation4], 0 }
   0x2   :  { %10 = vsyncpa [#allocation5], 0  ;;  %s255_s12 = smov [#allocation2]   ;;  %s205_s16 = scalar_lea.hbm %s374_s0, 256 }
   0x3   :  { %s16_s13 = sshll.u32 %s255_s12, 4  ;;  %p206_p0 = scmp.ne.s32.totalorder %s374_s0, %s205_s16  ;;  %s17_s13 = int_to_ptr.vmem [resolvable:$true] %s16_s13 }
   0x4   :  { %p209_p1 = scmp.lt.u32.totalorder %s205_s16, %s374_s0 }
   0x6   :  { %p211_p2 = pnand %p209_p1, %p206_p0 }
   0x8   :  { %214 = shalt.err (!%p211_p2)
}
   0x9   :  { %s215_s21 = scalar_lea.vmem %s17_s13, 256  ;;  %p220_p4 = scmp.lt.s32.totalorder %s17_s13, %s17_s13 }
   0xa   :  { %p216_p3 = scmp.ne.s32.totalorder %s17_s13, %s215_s21  ;;  %p221_p5 = scmp.lt.s32.totalorder %s215_s21, %s215_s21 }
   0xc   :  { %p222_p6 = por %p221_p5, %p220_p4 }
   0xe   :  { %p223_p7 = pnand %p222_p6, %p216_p3 }
  0x10   :  { %226 = shalt.err (!%p223_p7)
}
  0x11   :  { %s256_s22 = smov 128   ;;  %s257_s23 = smov 8  }
  0x12   :  { %22 = dma.hbm_to_vmem [thread:$0]  %s374_s0, 256, %s17_s13, [#allocation3], %s256_s22, %s256_s22, %s257_s23  }
  0x13   :  { %s227_s28 = scalar_lea.hbm %s375_s1, 64 }
  0x14   :  { %p228_p8 = scmp.ne.s32.totalorder %s375_s1, %s227_s28  ;;  %p231_p9 = scmp.lt.u32.totalorder %s227_s28, %s375_s1 }
  0x16   :  { %p233_p10 = pnand %p231_p9, %p228_p8 }
  0x18   :  { %236 = shalt.err (!%p233_p10)
}
  0x19   :  { %s258_s6 = smov [#allocation6]   ;;  %s37_s10 = sshll.u32 %s376_s2, 4  ;;  %s38_s10 = int_to_ptr.vmem [resolvable:$true] %s37_s10 }
  0x1a   :  { %30 = dma.hbm_to_smem %s375_s1, 64, %s258_s6, [#allocation4]  }
  0x1b   :  { %s237_s11 = scalar_lea.vmem %s38_s10, 16  ;;  %p242_p12 = scmp.lt.s32.totalorder %s38_s10, %s38_s10 }
  0x1c   :  { %p238_p11 = scmp.ne.s32.totalorder %s38_s10, %s237_s11  ;;  %p243_p13 = scmp.lt.s32.totalorder %s237_s11, %s237_s11 }
  0x1e   :  { %p244_p0 = por %p243_p13, %p242_p12 }
  0x20   :  { %p245_p1 = pnand %p244_p0, %p238_p11 }
  0x22   :  { %248 = shalt.err (!%p245_p1)
}
  0x23   :  { %s259_s12 = smov [#allocation7]  }
  0x24   :  { %40 = dma.vmem_to_smem %s38_s10, 16, %s259_s12, [#allocation5]  }
  0x25   :  { %249 = dma.done.wait [#allocation3], 256  }
  0x26   :  { %250 = vsyncadd [#allocation3], 4294967040 }
  0x27   :  { %251 = dma.done.wait [#allocation4], 64  }
  0x28   :  { %252 = vsyncadd [#allocation4], 4294967232 }
  0x29   :  { %253 = dma.done.wait [#allocation5], 16  }
  0x2a   :  { %254 = vsyncadd [#allocation5], 4294967280 }
  0x2b   :  { %50 = sfence }
  0x2c   :  { %s54_s1 = sld [smem:[#allocation6]]  ;;  %s182_s13 = sld [smem:[#allocation6 + $0x1]]  ;;  %v51_v0 = vld [vmem:[#allocation2] ss:$4 sm:$0x3]  ;;  %v92_v17 = vlaneseq }
  0x2d   :  { %s183_s2 = sld [smem:[#allocation6 + $0x2]]  ;;  %s184_s14 = sld [smem:[#allocation6 + $0x3]]  ;;  %v59_v1 = vld [vmem:[#allocation2 + $0x1] ss:$4 sm:$0x3] }
  0x2e   :  { %v53_v2 = vld [vmem:[#allocation2 + $0x8] ss:$4 sm:$0x3]  ;;  %s307_s15 = sld [smem:[#allocation7]]  ;;  %s311_s17 = sld [smem:[#allocation6 + $0x81]]  ;;  %vm320_vm0 = vcmp.lt.s32.totalorder %v92_v17, 256 }
  0x2f   :  { %v61_v3 = vld [vmem:[#allocation2 + $0x9] ss:$4 sm:$0x3]  ;;  %v69_v5 = vld [vmem:[#allocation2 + $0x2] ss:$4 sm:$0x3] }
  0x30   :  { %v71_v6 = vld [vmem:[#allocation2 + $0xa] ss:$4 sm:$0x3]  ;;  %v79_v9 = vld [vmem:[#allocation2 + $0x3] ss:$4 sm:$0x3] }
  0x31   :  { %s309_s16 = sld [smem:[#allocation6 + $0x80]]  ;;  %v81_v14 = vld [vmem:[#allocation2 + $0xb] ss:$4 sm:$0x3]  ;;  %s313_s18 = sld [smem:[#allocation6 + $0x82]] }
  0x32   :  { %v55_v4 = vstv %s54_s1  ;;  %v63_v8 = vstv %s182_s13  ;;  %v99_v19 = vld [vmem:[#allocation2] ss:$4 sm:$0x3]  ;;  %v105_v23 = vld [vmem:[#allocation2 + $0x1] ss:$4 sm:$0x3] }
  0x33   :  { %v56_v7 = vmul.f32 %v55_v4, %v51_v0  ;;  %v57_v10 = vmul.f32 %v55_v4, %v53_v2  ;;  %v64_v11 = vmul.f32 %v63_v8, %v59_v1  ;;  %v73_v12 = vstv %s183_s2  ;;  %s315_s19 = sld [smem:[#allocation6 + $0x83]]  ;;  %v113_v25 = vld [vmem:[#allocation2 + $0x2] ss:$4 sm:$0x3]  ;;  %s317_s20 = sld [smem:[#allocation7 + $0x1]] }
  0x34   :  { %v65_v13 = vmul.f32 %v63_v8, %v61_v3  ;;  %v74_v15 = vmul.f32 %v73_v12, %v69_v5  ;;  %v83_v16 = vstv %s184_s14  ;;  %v75_v18 = vmul.f32 %v73_v12, %v71_v6  ;;  %v100_v28 = vld [vmem:[#allocation2 + $0x8] ss:$4 sm:$0x3]  ;;  %v106_v29 = vld [vmem:[#allocation2 + $0x9] ss:$4 sm:$0x3] }
  0x35   :  { %v66_v20 = vadd.f32 %v64_v11, %v56_v7  ;;  %v84_v21 = vmul.f32 %v83_v16, %v79_v9  ;;  %v85_v24 = vmul.f32 %v83_v16, %v81_v14  ;;  %v89_v30 = vstv %s307_s15  ;;  %v121_v33 = vld [vmem:[#allocation2 + $0x3] ss:$4 sm:$0x3]  ;;  %s325_s21 = sld [smem:[#allocation6 + $0x100]]  ;;  %s328_s22 = sld [smem:[#allocation6 + $0x101]] }
  0x36   :  { %v67_v22 = vadd.f32 %v65_v13, %v57_v10  ;;  %v108_v37 = vstv %s311_s17  ;;  %v114_v38 = vld [vmem:[#allocation2 + $0xa] ss:$4 sm:$0x3]  ;;  %v122_v43 = vld [vmem:[#allocation2 + $0xb] ss:$4 sm:$0x3] }
  0x37   :  { %v76_v26 = vadd.f32 %v74_v15, %v66_v20  ;;  %v102_v32 = vstv %s309_s16  ;;  %v109_v39 = vmul.f32 %v108_v37, %v105_v23  ;;  %v116_v40 = vstv %s313_s18  ;;  %s331_s23 = sld [smem:[#allocation6 + $0x102]]  ;;  %v137_v48 = vld [vmem:[#allocation2] ss:$4 sm:$0x3]  ;;  %s334_s24 = sld [smem:[#allocation6 + $0x103]] }
  0x38   :  { %v77_v27 = vadd.f32 %v75_v18, %v67_v22  ;;  %v103_v36 = vmul.f32 %v102_v32, %v99_v19  ;;  %v104_v41 = vmul.f32 %v102_v32, %v100_v28  ;;  %v110_v42 = vmul.f32 %v108_v37, %v106_v29  ;;  %v143_v52 = vld [vmem:[#allocation2 + $0x1] ss:$4 sm:$0x3]  ;;  %v138_v53 = vld [vmem:[#allocation2 + $0x8] ss:$4 sm:$0x3] }
  0x39   :  { %v86_v34 = vadd.f32 %v84_v21, %v76_v26  ;;  %v117_v46 = vmul.f32 %v116_v40, %v113_v25  ;;  %v124_v47 = vstv %s315_s19  ;;  %v118_v54 = vmul.f32 %v116_v40, %v114_v38  ;;  %s346_s29 = sld [smem:[#allocation7 + $0x2]]  ;;  %v144_v56 = vld [vmem:[#allocation2 + $0x9] ss:$4 sm:$0x3] }
  0x3a   :  { %v87_v35 = vadd.f32 %v85_v24, %v77_v27  ;;  %v111_v49 = vadd.f32 %v109_v39, %v103_v36  ;;  %v125_v50 = vmul.f32 %v124_v47, %v121_v33  ;;  %v112_v51 = vadd.f32 %v110_v42, %v104_v41  ;;  %v151_v60 = vld [vmem:[#allocation2 + $0x2] ss:$4 sm:$0x3]  ;;  %v152_v61 = vld [vmem:[#allocation2 + $0xa] ss:$4 sm:$0x3] }
  0x3b   :  { %v90_v44 = vadd.f32 %v89_v30, %v86_v34  ;;  %v126_v55 = vmul.f32 %v124_v47, %v122_v43  ;;  %v130_v58 = vstv %s317_s20  ;;  %v140_v59 = vstv %s325_s21  ;;  %v159_v1 = vld [vmem:[#allocation2 + $0x3] ss:$4 sm:$0x3]  ;;  %v160_v7 = vld [vmem:[#allocation2 + $0xb] ss:$4 sm:$0x3] }
  0x3c   :  { %v91_v45 = vadd.f32 %v89_v30, %v87_v35  ;;  %v119_v57 = vadd.f32 %v117_v46, %v111_v49  ;;  %v120_v62 = vadd.f32 %v118_v54, %v112_v51  ;;  %v141_v63 = vmul.f32 %v140_v59, %v137_v48 }
  0x3d   :  { %96 = vst.msk [vmem:[%s377_s3] ss:$4 sm:$0x3] %vm320_vm0, %v90_v44  ;;  %v146_v0 = vstv %s328_s22  ;;  %v142_v2 = vmul.f32 %v140_v59, %v138_v53  ;;  %v154_v5 = vstv %s331_s23  ;;  %v162_v10 = vstv %s334_s24 }
  0x3e   :  { %185 = vst.msk [vmem:[%s377_s3 + $0x8] ss:$4 sm:$0x3] %vm320_vm0, %v91_v45  ;;  %v127_v3 = vadd.f32 %v125_v50, %v119_v57  ;;  %v147_v4 = vmul.f32 %v146_v0, %v143_v52  ;;  %v148_v6 = vmul.f32 %v146_v0, %v144_v56  ;;  %v128_v8 = vadd.f32 %v126_v55, %v120_v62 }
  0x3f   :  { %v155_v9 = vmul.f32 %v154_v5, %v151_v60  ;;  %v156_v11 = vmul.f32 %v154_v5, %v152_v61  ;;  %v163_v14 = vmul.f32 %v162_v10, %v159_v1  ;;  %v164_v17 = vmul.f32 %v162_v10, %v160_v7 }
  0x40   :  { %v131_v12 = vadd.f32 %v130_v58, %v127_v3  ;;  %v149_v13 = vadd.f32 %v147_v4, %v141_v63  ;;  %v132_v15 = vadd.f32 %v130_v58, %v128_v8  ;;  %v150_v16 = vadd.f32 %v148_v6, %v142_v2 }
  0x41   :  { %v168_v19 = vstv %s346_s29 }
  0x42   :  { %191 = vst.msk [vmem:[%s377_s3 + $0x1] ss:$4 sm:$0x3] %vm320_vm0, %v131_v12  ;;  %v157_v18 = vadd.f32 %v155_v9, %v149_v13  ;;  %192 = vst.msk [vmem:[%s377_s3 + $0x9] ss:$4 sm:$0x3] %vm320_vm0, %v132_v15  ;;  %v158_v20 = vadd.f32 %v156_v11, %v150_v16 }
  0x44   :  { %v165_v21 = vadd.f32 %v163_v14, %v157_v18  ;;  %v166_v22 = vadd.f32 %v164_v17, %v158_v20 }
  0x46   :  { %v169_v23 = vadd.f32 %v168_v19, %v165_v21  ;;  %v170_v24 = vadd.f32 %v168_v19, %v166_v22 }
  0x48   :  { %198 = vst.msk [vmem:[%s377_s3 + $0x2] ss:$4 sm:$0x3] %vm320_vm0, %v169_v23  ;;  %199 = vst.msk [vmem:[%s377_s3 + $0xa] ss:$4 sm:$0x3] %vm320_vm0, %v170_v24 }
  0x49   :  { %179 = vsyncpa [#allocation3], 1 }
  0x4a   :  { %180 = vsyncpa [#allocation4], 1 }
  0x4b   :  { %181 = vsyncpa [#allocation5], 1 }

</bundles_post_ra>
